<compile_context>
chip_gen: v7x
topology: tpu7x:2x2x1
jax: 0.10.0
libtpu: 0.0.40
codegen_flags: <defaults>
</compile_context>

<pallas_src>
import jax
import jax.numpy as jnp
from jax.experimental import pallas as pl
from jax.experimental.pallas import tpu as pltpu


def _round_up(x, m):
    return (x + m - 1) // m * m


def _qnet_kernel(x_ref, w1_ref, b1_ref, w2_ref, b2_ref, out_ref):
    # x_ref : (tb, In) f32          w1_ref: (In, H) bf16   b1_ref: (1, H) f32
    # w2_ref: (H, O)  bf16          b2_ref: (1, O)  f32    out_ref: (tb, O) f32
    x = x_ref[...].astype(w1_ref.dtype)               # in-kernel cast (free)
    h = jnp.dot(x, w1_ref[...], preferred_element_type=jnp.float32)
    h = jnp.maximum(h + b1_ref[...], 0.0)             # f32 epilogue (v5e-safe)
    y = jnp.dot(h.astype(w2_ref.dtype), w2_ref[...],
                preferred_element_type=jnp.float32)
    out_ref[...] = (y + b2_ref[...]).astype(out_ref.dtype)


def prepare_params(w1, b1, w2, b2, compute_dtype=jnp.bfloat16):
    """One-time pre-bake of nn.Linear params for the Pallas forward.

    Inputs use PyTorch layout: w1 (H, In), b1 (H,), w2 (O, H), b2 (O,).
    Returns weights transposed to (in, out) in the MXU compute dtype and
    biases as (1, n) f32 rows.  Call once at init / after optimizer steps,
    NOT per forward call.
    """
    return (jnp.asarray(w1).T.astype(compute_dtype),
            jnp.asarray(b1).astype(jnp.float32).reshape(1, -1),
            jnp.asarray(w2).T.astype(compute_dtype),
            jnp.asarray(b2).astype(jnp.float32).reshape(1, -1))


def linear_qnet_forward(x, w1t, b1r, w2t, b2r, *, block_b=2048, num_cores=1):
    """Fused MLP forward matching Linear_QNet.

    x   : (B, In) f32
    w1t : (In, H) bf16   b1r: (1, H) f32     (from prepare_params)
    w2t : (H, O)  bf16   b2r: (1, O) f32
    Returns (B, O) f32.
    Set num_cores=2 on v7x (2 TensorCores/chip) so the parallel batch axis
    splits across both cores; leave 1 on v5e/v6e.
    """
    B, In = x.shape
    In_w, H = w1t.shape
    H2, O = w2t.shape
    assert In == In_w and H == H2, "param shapes do not match input"

    # Batch tile: biggest tile possible (fewer grid steps -> less fixed
    # per-step overhead).  A block dim is legal if it is a multiple of 8 or
    # equals the full array dim, so tb=B is always valid for the single-step
    # case; otherwise keep tb a multiple of 8 and let the trailing partial
    # block be masked.
    if num_cores > 1 and B > 8:
        tb = min(block_b, _round_up(pl.cdiv(B, num_cores), 8))
    else:
        tb = min(block_b, B)
    grid = (pl.cdiv(B, tb),)

    cost = pl.CostEstimate(
        flops=2 * B * (In * H + H * O),
        transcendentals=0,
        bytes_accessed=(x.size * x.dtype.itemsize
                        + w1t.size * w1t.dtype.itemsize
                        + w2t.size * w2t.dtype.itemsize
                        + b1r.size * 4 + b2r.size * 4
                        + B * O * 4),
    )

    return pl.pallas_call(
        _qnet_kernel,
        out_shape=jax.ShapeDtypeStruct((B, O), jnp.float32),
        grid_spec=pltpu.PrefetchScalarGridSpec(
            num_scalar_prefetch=0,
            grid=grid,
            in_specs=[
                pl.BlockSpec((tb, In), lambda i: (i, 0)),   # x: tiled on batch
                pl.BlockSpec((In, H), lambda i: (0, 0)),    # w1: resident
                pl.BlockSpec((1, H), lambda i: (0, 0)),     # b1: resident
                pl.BlockSpec((H, O), lambda i: (0, 0)),     # w2: resident
                pl.BlockSpec((1, O), lambda i: (0, 0)),     # b2: resident
            ],
            out_specs=pl.BlockSpec((tb, O), lambda i: (i, 0)),
        ),
        compiler_params=pltpu.CompilerParams(
            dimension_semantics=("parallel",)),
        cost_estimate=cost,
    )(x, w1t, b1r, w2t, b2r)


def init_params(key, input_size, hidden_size, output_size):
    """nn.Linear-style init U(-1/sqrt(fan_in), +1/sqrt(fan_in)), PyTorch layout."""
    k1, k2, k3, k4 = jax.random.split(key, 4)
    bound1 = 1.0 / jnp.sqrt(input_size)
    bound2 = 1.0 / jnp.sqrt(hidden_size)
    w1 = jax.random.uniform(k1, (hidden_size, input_size), jnp.float32,
                            -bound1, bound1)
    b1 = jax.random.uniform(k2, (hidden_size,), jnp.float32, -bound1, bound1)
    w2 = jax.random.uniform(k3, (output_size, hidden_size), jnp.float32,
                            -bound2, bound2)
    b2 = jax.random.uniform(k4, (output_size,), jnp.float32, -bound2, bound2)
    return w1, b1, w2, b2
    # TODO(synk): Linear_QNet.save (torch.save checkpointing) is host-side I/O
    # with no Pallas equivalent.


if __name__ == "__main__":
    # Small shapes consistent with the module (snake-game style Q-net).
    batch, input_size, hidden_size, output_size = 32, 16, 32, 8

    key = jax.random.PRNGKey(0)
    kx, kp = jax.random.split(key)
    x = jax.random.normal(kx, (batch, input_size), jnp.float32)
    w1, b1, w2, b2 = init_params(kp, input_size, hidden_size, output_size)

    # Pre-bake params once (hoisted out of the per-forward path).
    params = prepare_params(w1, b1, w2, b2)

    # (1) Default config: grid collapses to a single overhead-minimal step.
    out = jax.block_until_ready(linear_qnet_forward(x, *params))
    assert out.shape == (batch, output_size)

    # (2) Tiny tile to exercise a multi-step, pipelined "parallel" grid (=(4,)).
    out_tiled = jax.block_until_ready(
        linear_qnet_forward(x, *params, block_b=8))
    assert out_tiled.shape == (batch, output_size)

    # Reference using the same bf16-input / f32-accumulate matmul math.
    w1t, b1r, w2t, b2r = params
    xb = x.astype(jnp.bfloat16)
    h_ref = jnp.maximum(
        jnp.dot(xb, w1t, preferred_element_type=jnp.float32) + b1r, 0.0)
    ref_bf16 = jnp.dot(h_ref.astype(jnp.bfloat16), w2t,
                       preferred_element_type=jnp.float32) + b2r
    assert jnp.allclose(out, ref_bf16, atol=1e-3, rtol=1e-3)
    assert jnp.allclose(out_tiled, ref_bf16, atol=1e-3, rtol=1e-3)

    # Loose check against the pure-f32 PyTorch-equivalent forward.
    ref_f32 = jnp.maximum(x @ w1.T + b1, 0.0) @ w2.T + b2
    assert jnp.allclose(out, ref_f32, atol=5e-2, rtol=5e-2)

    print("KERNEL_OK")
</pallas_src>

<mosaic_0001>
module attributes {stable_mosaic.version = 11 : i64} {
  func.func @_qnet_kernel(%arg0: i32, %arg1: memref<32x16xf32, #tpu.memory_space<vmem>>, %arg2: memref<16x32xbf16, #tpu.memory_space<vmem>>, %arg3: memref<1x32xf32, #tpu.memory_space<vmem>>, %arg4: memref<32x8xbf16, #tpu.memory_space<vmem>>, %arg5: memref<1x8xf32, #tpu.memory_space<vmem>>, %arg6: memref<32x8xf32, #tpu.memory_space<vmem>>) attributes {dimension_semantics = [#tpu.dimension_semantics<parallel>], iteration_bounds = array<i64: 1>, scalar_prefetch = 0 : i64, scratch_operands = 0 : i64, tpu.core_type = #tpu.core_type<tc>, window_params = [{transform_indices = @transform_0, window_bounds = array<i64: 32, 16>}, {pipeline_mode = #tpu.pipeline_mode<synchronous>, transform_indices = @transform_1, window_bounds = array<i64: 16, 32>}, {pipeline_mode = #tpu.pipeline_mode<synchronous>, transform_indices = @transform_2, window_bounds = array<i64: 1, 32>}, {pipeline_mode = #tpu.pipeline_mode<synchronous>, transform_indices = @transform_3, window_bounds = array<i64: 32, 8>}, {pipeline_mode = #tpu.pipeline_mode<synchronous>, transform_indices = @transform_4, window_bounds = array<i64: 1, 8>}, {transform_indices = @transform_5, window_bounds = array<i64: 32, 8>}]} {
    %c0 = arith.constant 0 : index
    %c0_0 = arith.constant 0 : index
    %0 = vector.load %arg1[%c0, %c0_0] : memref<32x16xf32, #tpu.memory_space<vmem>>, vector<32x16xf32>
    %1 = arith.truncf %0 : vector<32x16xf32> to vector<32x16xbf16>
    %c0_1 = arith.constant 0 : index
    %c0_2 = arith.constant 0 : index
    %2 = vector.load %arg2[%c0_1, %c0_2] : memref<16x32xbf16, #tpu.memory_space<vmem>>, vector<16x32xbf16>
    %cst = arith.constant dense<0.000000e+00> : vector<32x32xf32>
    %3 = tpu.matmul %1, %2, %cst {dimension_numbers = #tpu.dot_dimension_numbers<[1], [0], [0], [1], [0, 0, 1, 1], [], []>} : vector<32x16xbf16>, vector<16x32xbf16>, vector<32x32xf32> -> vector<32x32xf32>
    %c0_3 = arith.constant 0 : index
    %c0_4 = arith.constant 0 : index
    %4 = vector.load %arg3[%c0_3, %c0_4] : memref<1x32xf32, #tpu.memory_space<vmem>>, vector<1x32xf32>
    %5 = vector.broadcast %4 : vector<1x32xf32> to vector<32x32xf32>
    %6 = arith.addf %3, %5 : vector<32x32xf32>
    %cst_5 = arith.constant 0.000000e+00 : f32
    %7 = vector.broadcast %cst_5 : f32 to vector<32x32xf32>
    %8 = arith.maximumf %6, %7 : vector<32x32xf32>
    %9 = arith.truncf %8 : vector<32x32xf32> to vector<32x32xbf16>
    %c0_6 = arith.constant 0 : index
    %c0_7 = arith.constant 0 : index
    %10 = vector.load %arg4[%c0_6, %c0_7] : memref<32x8xbf16, #tpu.memory_space<vmem>>, vector<32x8xbf16>
    %cst_8 = arith.constant dense<0.000000e+00> : vector<32x8xf32>
    %11 = tpu.matmul %9, %10, %cst_8 {dimension_numbers = #tpu.dot_dimension_numbers<[1], [0], [0], [1], [0, 0, 1, 1], [], []>} : vector<32x32xbf16>, vector<32x8xbf16>, vector<32x8xf32> -> vector<32x8xf32>
    %c0_9 = arith.constant 0 : index
    %c0_10 = arith.constant 0 : index
    %12 = vector.load %arg5[%c0_9, %c0_10] : memref<1x8xf32, #tpu.memory_space<vmem>>, vector<1x8xf32>
    %13 = vector.broadcast %12 : vector<1x8xf32> to vector<32x8xf32>
    %14 = arith.addf %11, %13 : vector<32x8xf32>
    %c0_11 = arith.constant 0 : index
    %c0_12 = arith.constant 0 : index
    %15 = vector.load %arg6[%c0_11, %c0_12] : memref<32x8xf32, #tpu.memory_space<vmem>>, vector<32x8xf32>
    tpu.vector_store %arg6[%c0_11, %c0_12], %14 {strides = array<i32>} : memref<32x8xf32, #tpu.memory_space<vmem>>, vector<32x8xf32>,
    return
  }
  func.func @transform_0(%arg0: i32) -> (i32, i32) {
    %c0_i32 = arith.constant 0 : i32
    %c0_i32_0 = arith.constant 0 : i32
    return %arg0, %c0_i32 : i32, i32
  }
  func.func @transform_1(%arg0: i32) -> (i32, i32) {
    %c0_i32 = arith.constant 0 : i32
    %c0_i32_0 = arith.constant 0 : i32
    %c0_i32_1 = arith.constant 0 : i32
    return %c0_i32, %c0_i32_0 : i32, i32
  }
  func.func @transform_2(%arg0: i32) -> (i32, i32) {
    %c0_i32 = arith.constant 0 : i32
    %c0_i32_0 = arith.constant 0 : i32
    %c0_i32_1 = arith.constant 0 : i32
    return %c0_i32, %c0_i32_0 : i32, i32
  }
  func.func @transform_3(%arg0: i32) -> (i32, i32) {
    %c0_i32 = arith.constant 0 : i32
    %c0_i32_0 = arith.constant 0 : i32
    %c0_i32_1 = arith.constant 0 : i32
    return %c0_i32, %c0_i32_0 : i32, i32
  }
  func.func @transform_4(%arg0: i32) -> (i32, i32) {
    %c0_i32 = arith.constant 0 : i32
    %c0_i32_0 = arith.constant 0 : i32
    %c0_i32_1 = arith.constant 0 : i32
    return %c0_i32, %c0_i32_0 : i32, i32
  }
  func.func @transform_5(%arg0: i32) -> (i32, i32) {
    %c0_i32 = arith.constant 0 : i32
    %c0_i32_0 = arith.constant 0 : i32
    return %arg0, %c0_i32 : i32, i32
  }
}

</mosaic_0001>

<bundles_post_ra>
// kernel: tpu_custom_call.1
= control target key start
LH: loop header
LB: loop body
LE: loop exit
PB: predicated region body
PF: predicated region fallthrough
CT: control target
= control target key end

     0   :  { %vm42_vm0 = vcmask 130048   ;;  %vm127_vm1 = vcmask 261120   ;;  %vm183_vm2 = vcmask 64512   ;;  %s294_s1 = inlined_call_operand.vmem [shape: bf16[16,32], index: 1, kind: input, shape index: {}]   ;;  %s295_s0 = inlined_call_operand.vmem [shape: f32[32,16], index: 0, kind: input, shape index: {}]   ;;  %s296_s3 = inlined_call_operand.vmem [shape: bf16[32,8], index: 3, kind: input, shape index: {}]   ;;  %s297_s2 = inlined_call_operand.vmem [shape: f32[1,32], index: 2, kind: input, shape index: {}]   ;;  %s298_s4 = inlined_call_operand.vmem [shape: f32[1,8], index: 4, kind: input, shape index: {}]   ;;  %s299_s5 = inlined_call_operand.vmem [shape: f32[32,8], index: 5, kind: output, shape index: {}]  }
   0x1   :  { %v222_v0 = vld [vmem:[%s294_s1] sm:$0xff]   ;;  %v22_v2 = vld [vmem:[%s295_s0 + $0x8] sm:$0xff]  ;;  %v23_v3 = vld [vmem:[%s295_s0 + $0x10] sm:$0xff] }
   0x2   :  { %v21_v1 = vld [vmem:[%s295_s0] sm:$0xff]  ;;  %208 = vmatprep.subr.bf16.mxu0 %v222_v0  ;;  %v24_v5 = vld [vmem:[%s295_s0 + $0x18] sm:$0xff]  ;;  %v224_v8 = vld [vmem:[%s296_s3 + $0x8] sm:$0xff]  }
   0x3   :  { %v25_v4 = vpack.c.bf16 %v22_v2, %v21_v1  ;;  %209 = vmatpush3.bf16.msra.mxu0 %v222_v0  ;;  %v26_v6 = vpack.c.bf16 %v24_v5, %v23_v3  ;;  %v223_v7 = vld [vmem:[%s296_s3] sm:$0xff]  }
   0x4   :  { %214 = vmatprep.subr.bf16.mxu1 %v223_v7  ;;  %v192_v9 = vld [vmem:[%s297_s2] ss:$0 sm:$0xff] }
   0x5   :  { %210 = vmatprep.mubr.msk.bf16.mxu0 %vm42_vm0, %v25_v4  ;;  %215 = vmatpush3.bf16.msra.mxu1 %v223_v7  ;;  %v196_v24 = vld [vmem:[%s298_s4] ss:$0 sm:$0xff] }
   0x6   :  { %211 = vmatmul.mubr.msk.bf16.vlgmr.msra.gmra.mrb[0].mxu0 %vm42_vm0, %v26_v6  ;;  %216 = vmatprep.subr.bf16.mxu1 %v224_v8 }
   0x9   :  { %217 = vmatpush3.bf16.msra.mxu1 %v224_v8 }
  0xd9   :  { %v212_v10 = vpop.f32.mrb[0].mxu0 }
  0xda   :  { %v92_v11 = vadd.f32 %v212_v10, %v192_v9  ;;  %v83_v12 = vpop.f32.mrb[1].mxu0 }
  0xdb   :  { %v84_v13 = vadd.f32 %v192_v9, %v83_v12  ;;  %v213_v14 = vpop.f32.mrb[2].mxu0 }
  0xdc   :  { %v95_v15 = vadd.f32 %v213_v14, %v192_v9  ;;  %v86_v16 = vpop.f32.mrb[3].mxu0  ;;  %v100_v18 = vmax.f32 %v92_v11, 0.0 }
  0xdd   :  { %v87_v17 = vadd.f32 %v192_v9, %v86_v16  ;;  %v98_v20 = vmax.f32 %v84_v13, 0.0 }
  0xde   :  { %v101_v19 = vmax.f32 %v95_v15, 0.0 }
  0xdf   :  { %v99_v21 = vmax.f32 %v87_v17, 0.0 }
  0xe0   :  { %v103_v22 = vpack.c.bf16 %v101_v19, %v100_v18 }
  0xe1   :  { %v102_v23 = vpack.c.bf16 %v99_v21, %v98_v20 }
  0xe3   :  { %218 = vmatprep.mubr.msk.bf16.mxu1 %vm127_vm1, %v102_v23 }
  0xe4   :  { %219 = vmatmul.mubr.msk.bf16.vlgmr.msra.gmra.mrb[0].mxu1 %vm127_vm1, %v103_v22 }
 0x1b7   :  { %v220_v25 = vpop.f32.mrb[0].mxu1 }
 0x1b8   :  { %v177_v26 = vadd.f32 %v220_v25, %v196_v24  ;;  %v168_v27 = vpop.f32.mrb[1].mxu1 }
 0x1b9   :  { %v169_v28 = vadd.f32 %v196_v24, %v168_v27  ;;  %v221_v29 = vpop.f32.mrb[2].mxu1 }
 0x1ba   :  { %186 = vst.msk [vmem:[%s299_s5 + $0x10] sm:$0xff] %vm183_vm2, %v177_v26  ;;  %v180_v30 = vadd.f32 %v221_v29, %v196_v24  ;;  %v171_v31 = vpop.f32.mrb[3].mxu1 }
 0x1bb   :  { %184 = vst.msk [vmem:[%s299_s5] sm:$0xff] %vm183_vm2, %v169_v28  ;;  %v172_v32 = vadd.f32 %v196_v24, %v171_v31 }
 0x1bc   :  { %187 = vst.msk [vmem:[%s299_s5 + $0x18] sm:$0xff] %vm183_vm2, %v180_v30 }
 0x1bd   :  { %185 = vst.msk [vmem:[%s299_s5 + $0x8] sm:$0xff] %vm183_vm2, %v172_v32 }

</bundles_post_ra>
